<compile_context>
chip_gen: v7x
topology: tpu7x:2x2x1
jax: 0.10.0
libtpu: 0.0.40
codegen_flags: <defaults>
</compile_context>

<pallas_src>
import functools

import jax
import jax.numpy as jnp
from jax.experimental import pallas as pl
from jax.experimental.pallas import tpu as pltpu


def _vmem_budget_bytes():
    """~50% of this generation's VMEM (per TensorCore), clamped to [16, 64] MiB."""
    try:
        cap = int(pltpu.get_tpu_info().vmem_capacity_bytes)
    except Exception:
        cap = 64 * 1024 * 1024  # conservative fallback (matches v7x per-TC VMEM)
    return int(max(16 * 1024 * 1024, min(cap // 2, 64 * 1024 * 1024)))


def _pick_tile(hw, c, x_bytes, requested, budget):
    """Lane tile: fits the VMEM budget, capped at 4096 (no roofline win past ~2-4K lanes),
    128-aligned, and balanced so the last tile is not nearly empty."""
    if requested is None:
        # per-lane-column footprint: double-buffered inputs + ~10 live f32 (C,) planes
        per_col = 2 * (c * x_bytes + 4) + 10 * c * 4
        requested = min(4096, max(128, budget // per_col))
    if requested >= hw:
        return hw, 1, False                       # one full-width tile: always layout-legal
    n_tiles = pl.cdiv(hw, max(128, (requested // 128) * 128))
    tile_p = ((pl.cdiv(hw, n_tiles) + 127) // 128) * 128   # balanced, last dim multiple of 128
    if tile_p >= hw:
        return hw, 1, False
    n_tiles = pl.cdiv(hw, tile_p)
    return tile_p, n_tiles, (hw % tile_p) != 0


def _pick_k(n, c, hw, x_bytes):
    """Images folded per grid step (only used when one tile covers the whole image)."""
    per_image = c * hw * x_bytes + hw * 4
    cap = max(1, min(8, (512 * 1024) // max(per_image, 1)))
    k = 1
    for d in range(1, min(cap, n) + 1):           # largest divisor of n (avoids ragged images)
        if n % d == 0:
            k = d
    return k


def _lwce_partial_kernel(x_ref, t_ref, out_ref, *, hw, ragged):
    """Per-(image-block, pixel-tile) partials: out[:, 0]=per-class counts, out[:, 1]=NLL sums."""
    i = pl.program_id(1)                          # pixel-tile index
    k, c, tp = x_ref.shape

    valid = None
    if ragged:                                    # cheap (1, tp) tail predicate, reused below
        lane = jax.lax.broadcasted_iota(jnp.int32, (1, tp), 1)
        valid = (i * tp + lane) < hw
    cls = jax.lax.broadcasted_iota(jnp.int32, (c, tp), 0)   # regenerated, no VMEM scratch

    acc_cnt = jnp.zeros((c, 1), jnp.float32)
    acc_nll = jnp.zeros((c, 1), jnp.float32)
    for j in range(k):                            # static unroll over images in this block
        logits = x_ref[j].astype(jnp.float32)     # (c, tp) upcast in-kernel, HBM stays narrow
        tgt = t_ref[j].astype(jnp.int32)          # (1, tp) in-kernel cast
        if ragged:
            tgt = jnp.where(valid, tgt, -1)       # sentinel: tail lanes match no class
        eq = cls == tgt                           # (c, tp) one-hot predicate

        # stable log-sum-exp over the class (sublane) axis
        m = jnp.max(logits, axis=0, keepdims=True)                               # (1, tp)
        lse = jnp.log(jnp.sum(jnp.exp(logits - m), axis=0, keepdims=True)) + m   # (1, tp)
        if ragged:
            lse = jnp.where(valid, lse, 0.0)      # 0 * NaN != 0 inside the matmul -> zero it

        # MXU offload: (c, tp) @ (tp, 2) -> per-class [count, sum_lse]
        eq_f = eq.astype(jnp.float32)
        rhs = jnp.concatenate([jnp.ones_like(lse), lse], axis=0)                 # (2, tp)
        part = jax.lax.dot_general(
            eq_f, rhs, (((1,), (1,)), ((), ())),          # contract lanes of both (trans_b)
            precision=jax.lax.Precision.HIGHEST,
            preferred_element_type=jnp.float32)                                  # (c, 2)
        # picked-logit sum per class: one select (VALU) + one lane reduce (XLU)
        picked = jnp.sum(jnp.where(eq, logits, 0.0), axis=1, keepdims=True)      # (c, 1)

        acc_cnt = acc_cnt + part[:, 0:1]
        acc_nll = acc_nll + part[:, 1:2] - picked

    out_ref[...] = jnp.concatenate([acc_cnt, acc_nll], axis=1)


def label_weighted_cross_entropy_loss(logits_nchw, target_nhw, reduction="mean", tile_p=None):
    """Pallas TPU forward of LabelWeightedCrossEntropyLoss. Returns an f32 scalar."""
    assert reduction in ("mean", "sum")
    # TODO(synk): reduction='none' (per-pixel loss map) not implemented; needs a lane-dense
    #             (N, H*W) output spec instead of the per-tile (C, 2) partials.
    # TODO(synk): out-of-range labels (e.g. ignore_index=255) are silently dropped here;
    #             torch F.cross_entropy would error / need explicit ignore_index handling.
    N, C, H, W = logits_nchw.shape
    HW = H * W

    # Free reshapes only — no HBM transpose/copy, native dtypes kept in HBM.
    x = logits_nchw.reshape(N, C, HW)
    t = target_nhw.reshape(N, 1, HW)
    if t.dtype.itemsize > 4:                       # Pallas TPU has no 64-bit ints
        t = t.astype(jnp.int32)

    x_bytes = jnp.dtype(x.dtype).itemsize
    budget = _vmem_budget_bytes()
    tp, n_tiles, ragged = _pick_tile(HW, C, x_bytes, tile_p, budget)
    k = _pick_k(N, C, HW, x_bytes) if n_tiles == 1 else 1
    n_img_blocks = N // k

    kernel = functools.partial(_lwce_partial_kernel, hw=HW, ragged=ragged)
    parts = pl.pallas_call(
        kernel,
        out_shape=jax.ShapeDtypeStruct((n_img_blocks, n_tiles, C, 2), jnp.float32),
        grid_spec=pltpu.PrefetchScalarGridSpec(
            num_scalar_prefetch=0,
            grid=(n_img_blocks, n_tiles),
            in_specs=[
                pl.BlockSpec((k, C, tp), lambda n, i: (n, 0, i)),
                pl.BlockSpec((k, 1, tp), lambda n, i: (n, 0, i)),
            ],
            out_specs=pl.BlockSpec((None, None, C, 2), lambda n, i: (n, i, 0, 0)),
        ),
        compiler_params=pltpu.CompilerParams(
            dimension_semantics=("parallel", "parallel"),   # both axes shardable across TCs
            vmem_limit_bytes=budget,                        # same number the tile was sized to
        ),
        cost_estimate=pl.CostEstimate(
            flops=12 * C * N * HW,
            transcendentals=(C + 1) * N * HW,
            bytes_accessed=C * N * HW * x_bytes + N * HW * t.dtype.itemsize
                           + n_img_blocks * n_tiles * C * 2 * 4,
        ),
    )(x, t)

    # Tiny epilogue in plain JAX: combine partials, inverse-frequency weights.
    counts = jnp.sum(parts[..., 0], axis=(0, 1))      # (C,) pixels per class (whole batch)
    nll_sums = jnp.sum(parts[..., 1], axis=(0, 1))    # (C,) summed NLL per class
    # Missing classes (count==0) -> inf/NaN, matching the PyTorch module's requirements.
    w = 1.0 / counts
    w = w / jnp.sum(w)
    num = jnp.sum(w * nll_sums)                       # sum_i w[t_i] * nll_i
    if reduction == "mean":
        return num / jnp.sum(w * counts)              # / sum_i w[t_i]
    return num


def _reference(logits_nchw, target_nhw, reduction="mean"):
    """Pure-JAX reference matching torch semantics (all classes present)."""
    N, C, H, W = logits_nchw.shape
    x = jnp.transpose(logits_nchw, (0, 2, 3, 1)).reshape(-1, C).astype(jnp.float32)
    t = target_nhw.reshape(-1).astype(jnp.int32)
    counts = jnp.bincount(t, length=C).astype(jnp.float32)
    w = 1.0 / counts
    w = w / jnp.sum(w)
    lse = jax.scipy.special.logsumexp(x, axis=-1)
    nll = lse - x[jnp.arange(x.shape[0]), t]
    wt = w[t]
    if reduction == "mean":
        return jnp.sum(wt * nll) / jnp.sum(wt)
    return jnp.sum(wt * nll)


if __name__ == "__main__":
    key = jax.random.PRNGKey(0)
    k1, k2, k3, k4 = jax.random.split(key, 4)

    # Test 1: f32 NCHW logits, 'mean', auto tile (single full-width tile, k=2 image batching).
    N, C, H, W = 2, 4, 16, 16
    logits = jax.random.normal(k1, (N, C, H, W), dtype=jnp.float32)
    target = jax.random.randint(k2, (N, H, W), 0, C, dtype=jnp.int32)
    loss = jax.block_until_ready(label_weighted_cross_entropy_loss(logits, target, "mean"))
    ref = _reference(logits, target, "mean")
    assert jnp.allclose(loss, ref, rtol=1e-5, atol=1e-5), (loss, ref)

    # Test 2: bf16 logits, ragged pixel tail (H*W=400 with forced tile_p=128), 'sum'.
    N2, C2, H2, W2 = 2, 4, 20, 20
    logits2 = jax.random.normal(k3, (N2, C2, H2, W2), dtype=jnp.bfloat16)
    target2 = jax.random.randint(k4, (N2, H2, W2), 0, C2, dtype=jnp.int32)
    loss2 = jax.block_until_ready(
        label_weighted_cross_entropy_loss(logits2, target2, "sum", tile_p=128))
    ref2 = _reference(logits2, target2, "sum")
    assert jnp.allclose(loss2, ref2, rtol=1e-3, atol=1e-3), (loss2, ref2)

    print("KERNEL_OK")
</pallas_src>

<mosaic_0001>
module attributes {stable_mosaic.version = 11 : i64} {
  func.func @_lwce_partial_kernel(%arg0: i32, %arg1: i32, %arg2: memref<2x4x256xf32, #tpu.memory_space<vmem>>, %arg3: memref<2x1x256xi32, #tpu.memory_space<vmem>>, %arg4: memref<1x1x4x2xf32, #tpu.memory_space<vmem>>) attributes {dimension_semantics = [#tpu.dimension_semantics<parallel>, #tpu.dimension_semantics<parallel>], iteration_bounds = array<i64: 1, 1>, scalar_prefetch = 0 : i64, scratch_operands = 0 : i64, tpu.core_type = #tpu.core_type<tc>, window_params = [{transform_indices = @transform_0, window_bounds = array<i64: 2, 4, 256>}, {transform_indices = @transform_1, window_bounds = array<i64: 2, 1, 256>}, {transform_indices = @transform_2, window_bounds = array<i64: 1, 1, 4, 2>}]} {
    %0 = tpu.iota {dimensions = array<i32: 0>} : vector<4x256xi32>
    %cst = arith.constant 0.000000e+00 : f32
    %1 = vector.broadcast %cst : f32 to vector<4x1xf32>
    %cst_0 = arith.constant 0.000000e+00 : f32
    %2 = vector.broadcast %cst_0 : f32 to vector<4x1xf32>
    %c0 = arith.constant 0 : index
    %c0_1 = arith.constant 0 : index
    %c0_2 = arith.constant 0 : index
    %3 = vector.load %arg2[%c0, %c0_1, %c0_2] : memref<2x4x256xf32, #tpu.memory_space<vmem>>, vector<1x4x256xf32>
    %4 = vector.shape_cast %3 : vector<1x4x256xf32> to vector<4x256xf32>
    %c0_3 = arith.constant 0 : index
    %c0_4 = arith.constant 0 : index
    %c0_5 = arith.constant 0 : index
    %5 = vector.load %arg3[%c0_3, %c0_4, %c0_5] : memref<2x1x256xi32, #tpu.memory_space<vmem>>, vector<1x1x256xi32>
    %6 = vector.shape_cast %5 : vector<1x1x256xi32> to vector<1x256xi32>
    %7 = vector.broadcast %6 : vector<1x256xi32> to vector<4x256xi32>
    %8 = arith.cmpi eq, %0, %7 : vector<4x256xi32>
    %cst_6 = arith.constant dense<0xFF800000> : vector<256xf32>
    %9 = vector.multi_reduction <maximumf>, %4, %cst_6 [0] : vector<4x256xf32> to vector<256xf32>
    %10 = vector.shape_cast %9 : vector<256xf32> to vector<1x256xf32>
    %11 = vector.broadcast %10 : vector<1x256xf32> to vector<4x256xf32>
    %12 = arith.subf %4, %11 : vector<4x256xf32>
    %13 = math.exp %12 : vector<4x256xf32>
    %cst_7 = arith.constant dense<0.000000e+00> : vector<256xf32>
    %14 = vector.multi_reduction <add>, %13, %cst_7 [0] : vector<4x256xf32> to vector<256xf32>
    %15 = vector.shape_cast %14 : vector<256xf32> to vector<1x256xf32>
    %16 = math.log %15 : vector<1x256xf32>
    %17 = arith.addf %16, %10 : vector<1x256xf32>
    %18 = arith.extui %8 : vector<4x256xi1> to vector<4x256xi32>
    %19 = arith.sitofp %18 : vector<4x256xi32> to vector<4x256xf32>
    %cst_8 = arith.constant 1.000000e+00 : f32
    %20 = vector.broadcast %cst_8 : f32 to vector<1x256xf32>
    %21 = tpu.concatenate %20, %17 in 0 : vector<1x256xf32>, vector<1x256xf32> -> vector<2x256xf32>
    %cst_9 = arith.constant dense<0.000000e+00> : vector<4x2xf32>
    %22 = tpu.matmul %19, %21, %cst_9 {dimension_numbers = #tpu.dot_dimension_numbers<[1], [1], [0], [0], [0, 0, 1, 0], [], []>, precision = #tpu.contract_precision<fp32>} : vector<4x256xf32>, vector<2x256xf32>, vector<4x2xf32> -> vector<4x2xf32>
    %cst_10 = arith.constant 0.000000e+00 : f32
    %23 = vector.broadcast %cst_10 : f32 to vector<4x256xf32>
    %24 = arith.select %8, %4, %23 : vector<4x256xi1>, vector<4x256xf32>
    %cst_11 = arith.constant dense<0.000000e+00> : vector<4xf32>
    %25 = vector.multi_reduction <add>, %24, %cst_11 [1] : vector<4x256xf32> to vector<4xf32>
    %26 = vector.shape_cast %25 : vector<4xf32> to vector<4x1xf32>
    %27 = vector.extract_strided_slice %22 {offsets = [0, 0], sizes = [4, 1], strides = [1, 1]} : vector<4x2xf32> to vector<4x1xf32>
    %28 = arith.addf %1, %27 : vector<4x1xf32>
    %29 = vector.extract_strided_slice %22 {offsets = [0, 1], sizes = [4, 1], strides = [1, 1]} : vector<4x2xf32> to vector<4x1xf32>
    %30 = arith.addf %2, %29 : vector<4x1xf32>
    %31 = arith.subf %30, %26 : vector<4x1xf32>
    %c1 = arith.constant 1 : index
    %c0_12 = arith.constant 0 : index
    %c0_13 = arith.constant 0 : index
    %32 = vector.load %arg2[%c1, %c0_12, %c0_13] : memref<2x4x256xf32, #tpu.memory_space<vmem>>, vector<1x4x256xf32>
    %33 = vector.shape_cast %32 : vector<1x4x256xf32> to vector<4x256xf32>
    %c1_14 = arith.constant 1 : index
    %c0_15 = arith.constant 0 : index
    %c0_16 = arith.constant 0 : index
    %34 = vector.load %arg3[%c1_14, %c0_15, %c0_16] : memref<2x1x256xi32, #tpu.memory_space<vmem>>, vector<1x1x256xi32>
    %35 = vector.shape_cast %34 : vector<1x1x256xi32> to vector<1x256xi32>
    %36 = vector.broadcast %35 : vector<1x256xi32> to vector<4x256xi32>
    %37 = arith.cmpi eq, %0, %36 : vector<4x256xi32>
    %cst_17 = arith.constant dense<0xFF800000> : vector<256xf32>
    %38 = vector.multi_reduction <maximumf>, %33, %cst_17 [0] : vector<4x256xf32> to vector<256xf32>
    %39 = vector.shape_cast %38 : vector<256xf32> to vector<1x256xf32>
    %40 = vector.broadcast %39 : vector<1x256xf32> to vector<4x256xf32>
    %41 = arith.subf %33, %40 : vector<4x256xf32>
    %42 = math.exp %41 : vector<4x256xf32>
    %cst_18 = arith.constant dense<0.000000e+00> : vector<256xf32>
    %43 = vector.multi_reduction <add>, %42, %cst_18 [0] : vector<4x256xf32> to vector<256xf32>
    %44 = vector.shape_cast %43 : vector<256xf32> to vector<1x256xf32>
    %45 = math.log %44 : vector<1x256xf32>
    %46 = arith.addf %45, %39 : vector<1x256xf32>
    %47 = arith.extui %37 : vector<4x256xi1> to vector<4x256xi32>
    %48 = arith.sitofp %47 : vector<4x256xi32> to vector<4x256xf32>
    %cst_19 = arith.constant 1.000000e+00 : f32
    %49 = vector.broadcast %cst_19 : f32 to vector<1x256xf32>
    %50 = tpu.concatenate %49, %46 in 0 : vector<1x256xf32>, vector<1x256xf32> -> vector<2x256xf32>
    %cst_20 = arith.constant dense<0.000000e+00> : vector<4x2xf32>
    %51 = tpu.matmul %48, %50, %cst_20 {dimension_numbers = #tpu.dot_dimension_numbers<[1], [1], [0], [0], [0, 0, 1, 0], [], []>, precision = #tpu.contract_precision<fp32>} : vector<4x256xf32>, vector<2x256xf32>, vector<4x2xf32> -> vector<4x2xf32>
    %cst_21 = arith.constant 0.000000e+00 : f32
    %52 = vector.broadcast %cst_21 : f32 to vector<4x256xf32>
    %53 = arith.select %37, %33, %52 : vector<4x256xi1>, vector<4x256xf32>
    %cst_22 = arith.constant dense<0.000000e+00> : vector<4xf32>
    %54 = vector.multi_reduction <add>, %53, %cst_22 [1] : vector<4x256xf32> to vector<4xf32>
    %55 = vector.shape_cast %54 : vector<4xf32> to vector<4x1xf32>
    %56 = vector.extract_strided_slice %51 {offsets = [0, 0], sizes = [4, 1], strides = [1, 1]} : vector<4x2xf32> to vector<4x1xf32>
    %57 = arith.addf %28, %56 : vector<4x1xf32>
    %58 = vector.extract_strided_slice %51 {offsets = [0, 1], sizes = [4, 1], strides = [1, 1]} : vector<4x2xf32> to vector<4x1xf32>
    %59 = arith.addf %31, %58 : vector<4x1xf32>
    %60 = arith.subf %59, %55 : vector<4x1xf32>
    %61 = tpu.concatenate %57, %60 in 1 : vector<4x1xf32>, vector<4x1xf32> -> vector<4x2xf32>
    %c0_23 = arith.constant 0 : index
    %c0_24 = arith.constant 0 : index
    %c0_25 = arith.constant 0 : index
    %c0_26 = arith.constant 0 : index
    %62 = vector.load %arg4[%c0_23, %c0_24, %c0_25, %c0_26] : memref<1x1x4x2xf32, #tpu.memory_space<vmem>>, vector<1x1x4x2xf32>
    %63 = vector.shape_cast %62 : vector<1x1x4x2xf32> to vector<4x2xf32>
    %64 = vector.shape_cast %61 : vector<4x2xf32> to vector<1x1x4x2xf32>
    tpu.vector_store %arg4[%c0_23, %c0_24, %c0_25, %c0_26], %64 {strides = array<i32>} : memref<1x1x4x2xf32, #tpu.memory_space<vmem>>, vector<1x1x4x2xf32>,
    return
  }
  func.func @transform_0(%arg0: i32, %arg1: i32) -> (i32, i32, i32) {
    %c0_i32 = arith.constant 0 : i32
    %c0_i32_0 = arith.constant 0 : i32
    return %arg0, %c0_i32, %arg1 : i32, i32, i32
  }
  func.func @transform_1(%arg0: i32, %arg1: i32) -> (i32, i32, i32) {
    %c0_i32 = arith.constant 0 : i32
    %c0_i32_0 = arith.constant 0 : i32
    return %arg0, %c0_i32, %arg1 : i32, i32, i32
  }
  func.func @transform_2(%arg0: i32, %arg1: i32) -> (i32, i32, i32, i32) {
    %c0_i32 = arith.constant 0 : i32
    %c0_i32_0 = arith.constant 0 : i32
    %c0_i32_1 = arith.constant 0 : i32
    return %arg0, %arg1, %c0_i32, %c0_i32_0 : i32, i32, i32, i32
  }
}

</mosaic_0001>

<bundles_post_ra>
// kernel: tpu_custom_call.1
= control target key start
LH: loop header
LB: loop body
LE: loop exit
PB: predicated region body
PF: predicated region fallthrough
CT: control target
= control target key end

     0   :  { %7 = vsyncpa [#allocation3], 0  ;;  %s1462_s0 = inlined_call_operand.hbm [shape: f32[2,4,256], index: 0, kind: input, shape index: {}]   ;;  %s1463_s1 = inlined_call_operand.hbm [shape: s32[2,1,256], index: 1, kind: input, shape index: {}]   ;;  %s1464_s2 = inlined_call_operand.vmem [shape: f32[1,1,4,2], index: 2, kind: output, shape index: {}]  }
   0x1   :  { %8 = vsyncpa [#allocation5], 0  ;;  %s1254_s9 = smov [#allocation2]   ;;  %s1206_s13 = scalar_lea.hbm %s1462_s0, 256 }
   0x2   :  { %s14_s10 = sshll.u32 %s1254_s9, 4  ;;  %p1207_p0 = scmp.ne.s32.totalorder %s1462_s0, %s1206_s13  ;;  %s15_s10 = int_to_ptr.vmem [resolvable:$true] %s14_s10 }
   0x3   :  { %p1210_p1 = scmp.lt.u32.totalorder %s1206_s13, %s1462_s0 }
   0x5   :  { %p1212_p2 = pnand %p1210_p1, %p1207_p0 }
   0x7   :  { %1215 = shalt.err (!%p1212_p2)
}
   0x8   :  { %s1216_s18 = scalar_lea.vmem %s15_s10, 256  ;;  %p1221_p4 = scmp.lt.s32.totalorder %s15_s10, %s15_s10 }
   0x9   :  { %p1217_p3 = scmp.ne.s32.totalorder %s15_s10, %s1216_s18  ;;  %p1222_p5 = scmp.lt.s32.totalorder %s1216_s18, %s1216_s18 }
   0xb   :  { %p1223_p6 = por %p1222_p5, %p1221_p4 }
   0xd   :  { %p1224_p7 = pnand %p1223_p6, %p1217_p3 }
   0xf   :  { %1227 = shalt.err (!%p1224_p7)
}
  0x10   :  { %s1255_s19 = smov 128   ;;  %s1256_s20 = smov 8  }
  0x11   :  { %20 = dma.hbm_to_vmem [thread:$0]  %s1462_s0, 256, %s15_s10, [#allocation3], %s1255_s19, %s1255_s19, %s1256_s20  }
  0x12   :  { %s1257_s23 = smov [#allocation4]   ;;  %s1228_s27 = scalar_lea.hbm %s1463_s1, 64 }
  0x13   :  { %s26_s24 = sshll.u32 %s1257_s23, 4  ;;  %p1229_p8 = scmp.ne.s32.totalorder %s1463_s1, %s1228_s27  ;;  %s27_s24 = int_to_ptr.vmem [resolvable:$true] %s26_s24 }
  0x14   :  { %p1232_p9 = scmp.lt.u32.totalorder %s1228_s27, %s1463_s1 }
  0x16   :  { %p1234_p10 = pnand %p1232_p9, %p1229_p8 }
  0x18   :  { %1237 = shalt.err (!%p1234_p10)
}
  0x19   :  { %s1238_s4 = scalar_lea.vmem %s27_s24, 64  ;;  %p1243_p12 = scmp.lt.s32.totalorder %s27_s24, %s27_s24 }
  0x1a   :  { %p1239_p11 = scmp.ne.s32.totalorder %s27_s24, %s1238_s4  ;;  %p1244_p13 = scmp.lt.s32.totalorder %s1238_s4, %s1238_s4 }
  0x1c   :  { %p1245_p0 = por %p1244_p13, %p1243_p12 }
  0x1e   :  { %p1246_p1 = pnand %p1245_p0, %p1239_p11 }
  0x20   :  { %1249 = shalt.err (!%p1246_p1)
}
  0x21   :  { %s1258_s0 = smov 32   ;;  %s1259_s5 = smov 2  }
  0x22   :  { %32 = dma.hbm_to_vmem [thread:$0]  %s1463_s1, 64, %s27_s24, [#allocation5], %s1258_s0, %s1258_s0, %s1259_s5  }
  0x23   :  { %1250 = dma.done.wait [#allocation3], 256  }
  0x24   :  { %1251 = vsyncadd [#allocation3], 4294967040 }
  0x25   :  { %1252 = dma.done.wait [#allocation5], 64  }
  0x26   :  { %1253 = vsyncadd [#allocation5], 4294967232  ;;  %v39_v0 = vlaneseq  ;;  %vm56_vm0 = vcmask 1043456   ;;  %v1301_v3 = vld [vmem:[#allocation2] sm:$0xff]  ;;  %v1303_v4 = vld [vmem:[#allocation2 + $0x8] sm:$0xff]  ;;  %v1260_v28 = vmov 0.0  }
  0x27   :  { %v42_v5 = vld [vmem:[#allocation4] sm:$0x3]  ;;  %v54_v6 = vcombine.high %v1301_v3, %v1301_v3  ;;  %v57_v7 = vsel %vm56_vm0, %v1301_v3, -inf  ;;  %v1311_v8 = vcombine.high %v1303_v4, %v1303_v4  ;;  %v606_v9 = vsel %vm56_vm0, %v1303_v4, -inf  ;;  %v592_v10 = vld [vmem:[#allocation4 + $0x2] sm:$0x3] }
  0x28   :  { %v40_v1 = vshrl.u32 %v39_v0, 7  ;;  %v58_v11 = vrot.slane %v57_v7, 4  ;;  %v607_v12 = vrot.slane %v606_v9, 4  ;;  %vm105_vm5 = vcmask 1040384  }
  0x29   :  { %v64_v14 = vsel %vm56_vm0, %v54_v6, -inf  ;;  %v613_v15 = vsel %vm56_vm0, %v1311_v8, -inf  ;;  %vm1138_vm6 = vcmask 7168   ;;  %vm1140_vm7 = vcmask 11264  }
  0x2a   :  { %v49_v2 = vsub.s32 1, %v40_v1  ;;  %v59_v17 = vmax.f32 %v57_v7, %v58_v11  ;;  %v65_v18 = vrot.slane %v64_v14, 4  ;;  %v608_v19 = vmax.f32 %v606_v9, %v607_v12 }
  0x2b   :  { %v614_v20 = vrot.slane %v613_v15, 4  ;;  %v45_v21 = vsub.s32 0, %v40_v1 }
  0x2c   :  { %v50_v13 = vrot.slane %v42_v5, %v49_v2  ;;  %v600_v16 = vrot.slane %v592_v10, %v49_v2  ;;  %v60_v24 = vrot.slane %v59_v17, 2  ;;  %v66_v25 = vmax.f32 %v64_v14, %v65_v18 }
  0x2d   :  { %v609_v26 = vrot.slane %v608_v19, 2  ;;  %v615_v27 = vmax.f32 %v613_v15, %v614_v20  ;;  %v46_v35 = vrot.slane %v42_v5, %v45_v21  ;;  %v596_v43 = vrot.slane %v592_v10, %v45_v21 }
  0x2e   :  { %vm1318_vm1 = vcmp.eq.s32.totalorder %v40_v1, %v50_v13  ;;  %vm1322_vm2 = vcmp.eq.s32.totalorder %v40_v1, %v600_v16  ;;  %v61_v31 = vmax.f32 %v59_v17, %v60_v24  ;;  %v67_v32 = vrot.slane %v66_v25, 2 }
  0x2f   :  { %v1149_v29 = vsel %vm1318_vm1, 1.0, %v1260_v28  ;;  %v1157_v30 = vsel %vm1322_vm2, 1.0, %v1260_v28  ;;  %v610_v33 = vmax.f32 %v608_v19, %v609_v26  ;;  %v616_v34 = vrot.slane %v615_v27, 2 }
  0x30   :  { %v1332_v36 = vsub.f32 %v1149_v29, %v1149_v29  ;;  %v1334_v37 = vsub.f32 %v1157_v30, %v1157_v30  ;;  %v62_v38 = vrot.slane %v61_v31, 1  ;;  %v68_v39 = vmax.f32 %v66_v25, %v67_v32 }
  0x31   :  { %v611_v40 = vrot.slane %v610_v33, 1  ;;  %v617_v41 = vmax.f32 %v615_v27, %v616_v34  ;;  %vm1348_vm3 = vcmp.eq.s32.totalorder %v40_v1, %v46_v35  ;;  %v581_v55 = vsel %vm1318_vm1, %v54_v6, 0.0 }
  0x32   :  { %v176_v42 = vand.u32 4294901760, %v1332_v36  ;;  %v724_v44 = vand.u32 4294901760, %v1334_v37  ;;  %v1338_v45 = vmax.f32 %v61_v31, %v62_v38  ;;  %v69_v46 = vrot.slane %v68_v39, 1 }
  0x33   :  { %v1340_v47 = vmax.f32 %v610_v33, %v611_v40  ;;  %v618_v48 = vrot.slane %v617_v41, 1  ;;  %v580_v54 = vsel %vm1348_vm3, %v1301_v3, 0.0  ;;  %vm1361_vm4 = vcmp.eq.s32.totalorder %v40_v1, %v596_v43 }
  0x34   :  { %v177_v49 = vsub.f32 %v1332_v36, %v176_v42  ;;  %v725_v50 = vsub.f32 %v1334_v37, %v724_v44  ;;  %v1352_v52 = vmax.f32 %v68_v39, %v69_v46  ;;  %v582_v61 = vsel %vm56_vm0, %v580_v54, 0.0 }
  0x35   :  { %v1354_v53 = vmax.f32 %v617_v41, %v618_v48  ;;  %v583_v62 = vsel %vm56_vm0, %v581_v55, 0.0  ;;  %v1128_v0 = vsel %vm1361_vm4, %v1303_v4, 0.0  ;;  %v1129_v1 = vsel %vm1322_vm2, %v1311_v8, 0.0 }
  0x36   :  { %v178_v56 = vand.u32 4294901760, %v177_v49  ;;  %v726_v57 = vand.u32 4294901760, %v725_v50  ;;  %v73_v59 = vcombine.low %v1338_v45, %v1352_v52  ;;  %v584_v63 = vadd.f32 %v583_v62, %v582_v61 }
  0x37   :  { %v622_v60 = vcombine.low %v1340_v47, %v1354_v53  ;;  %v1130_v6 = vsel %vm56_vm0, %v1128_v0, 0.0  ;;  %v1131_v7 = vsel %vm56_vm0, %v1129_v1, 0.0  ;;  %v1148_v50 = vsel %vm1348_vm3, 1.0, %v1260_v28 }
  0x38   :  { %179 = vmatprep.mubr.f32.mxu0 %v178_v56  ;;  %727 = vmatprep.mubr.f32.mxu1 %v726_v57  ;;  %v75_v2 = vsub.f32 %v1301_v3, %v73_v59  ;;  %v1132_v9 = vadd.f32 %v1131_v7, %v1130_v6  ;;  %v1156_v54 = vsel %vm1361_vm4, 1.0, %v1260_v28  ;;  %v1391_v55 = vsub.f32 %v1148_v50, %v1148_v50 }
  0x39   :  { %v624_v5 = vsub.f32 %v1303_v4, %v622_v60  ;;  %585 = vadd.xlane.f32.xlu0 %v584_v63  ;;  %v1393_v56 = vsub.f32 %v1156_v54, %v1156_v54 }
  0x3a   :  { %v76_v10 = vmul.f32 1.442695, %v75_v2  ;;  %v182_v63 = vand.u32 4294901760, %v1391_v55 }
  0x3b   :  { %v625_v11 = vmul.f32 1.442695, %v624_v5  ;;  %v730_v5 = vand.u32 4294901760, %v1393_v56 }
  0x3c   :  { %1194 = vpow2.f32 %v76_v10 }
  0x3d   :  { %1196 = vpow2.f32 %v625_v11  ;;  %1133 = vadd.xlane.f32.xlu0 %v1132_v9 }
  0x46   :  { %v1195_v12 = vpop.eup %1194 }
  0x47   :  { %v1197_v13 = vpop.eup %1196  ;;  %v79_v14 = vcombine.high %v1195_v12, %v1195_v12  ;;  %v81_v8 = vsel %vm56_vm0, %v1195_v12, 0.0 }
  0x48   :  { %v628_v15 = vcombine.high %v1197_v13, %v1197_v13  ;;  %v82_v3 = vrot.slane %v81_v8, 4  ;;  %v630_v4 = vsel %vm56_vm0, %v1197_v13, 0.0  ;;  %v183_v13 = vsub.f32 %v1391_v55, %v182_v63 }
  0x49   :  { %v88_v16 = vsel %vm56_vm0, %v79_v14, 0.0  ;;  %v631_v17 = vrot.slane %v630_v4, 4 }
  0x4a   :  { %v89_v18 = vrot.slane %v88_v16, 4  ;;  %v637_v19 = vsel %vm56_vm0, %v628_v15, 0.0  ;;  %v83_v20 = vadd.f32 %v82_v3, %v81_v8 }
  0x4b   :  { %v638_v21 = vrot.slane %v637_v19, 4  ;;  %v632_v24 = vadd.f32 %v631_v17, %v630_v4  ;;  %v184_v4 = vand.u32 4294901760, %v183_v13 }
  0x4c   :  { %v90_v25 = vadd.f32 %v89_v18, %v88_v16  ;;  %v84_v26 = vrot.slane %v83_v20, 2 }
  0x4d   :  { %v639_v27 = vadd.f32 %v638_v21, %v637_v19  ;;  %v633_v29 = vrot.slane %v632_v24, 2 }
  0x4e   :  { %v91_v30 = vrot.slane %v90_v25, 2  ;;  %v85_v31 = vadd.f32 %v84_v26, %v83_v20 }
  0x4f   :  { %v640_v32 = vrot.slane %v639_v27, 2  ;;  %v634_v33 = vadd.f32 %v633_v29, %v632_v24 }
  0x50   :  { %v92_v34 = vadd.f32 %v91_v30, %v90_v25  ;;  %v86_v35 = vrot.slane %v85_v31, 1 }
  0x51   :  { %v641_v38 = vadd.f32 %v640_v32, %v639_v27  ;;  %v635_v39 = vrot.slane %v634_v33, 1 }
  0x52   :  { %v93_v40 = vrot.slane %v92_v34, 1  ;;  %v87_v41 = vadd.f32 %v86_v35, %v85_v31  ;;  %v1261_v31 = vmov 1.0  }
  0x53   :  { %v642_v43 = vrot.slane %v641_v38, 1  ;;  %v636_v46 = vadd.f32 %v635_v39, %v634_v33 }
  0x54   :  { %v94_v48 = vadd.f32 %v93_v40, %v92_v34  ;;  %1198 = vlog2.f32 %v87_v41 }
  0x55   :  { %v643_v49 = vadd.f32 %v642_v43, %v641_v38  ;;  %1200 = vlog2.f32 %v636_v46 }
  0x56   :  { %1202 = vlog2.f32 %v94_v48 }
  0x57   :  { %1204 = vlog2.f32 %v643_v49 }
  0x5e   :  { %v1199_v57 = vpop.eup %1198 }
  0x5f   :  { %v1201_v59 = vpop.eup %1200  ;;  %v96_v60 = vmul.f32 0.6931472, %v1199_v57 }
  0x60   :  { %v1203_v61 = vpop.eup %1202  ;;  %v645_v62 = vmul.f32 0.6931472, %v1201_v59 }
  0x61   :  { %v1205_v0 = vpop.eup %1204  ;;  %v98_v1 = vmul.f32 0.6931472, %v1203_v61  ;;  %v99_v2 = vadd.f32 %v96_v60, %v1338_v45 }
  0x62   :  { %v647_v6 = vmul.f32 0.6931472, %v1205_v0  ;;  %v648_v28 = vadd.f32 %v645_v62, %v1340_v47  ;;  %v731_v47 = vsub.f32 %v1393_v56, %v730_v5 }
  0x63   :  { %v100_v7 = vadd.f32 %v98_v1, %v1352_v52  ;;  %v106_v9 = vsel %vm105_vm5, 1.0, %v99_v2 }
  0x64   :  { %v649_v10 = vadd.f32 %v647_v6, %v1354_v53  ;;  %v1402_v11 = vand.u32 4294901760, %v106_v9  ;;  %v654_v12 = vsel %vm105_vm5, 1.0, %v648_v28  ;;  %v732_v18 = vand.u32 4294901760, %v731_v47 }
  0x65   :  { %v107_v45 = vsel %vm105_vm5, 1.0, %v100_v7  ;;  %v1409_v14 = vand.u32 4294901760, %v654_v12 }
  0x66   :  { %v108_v52 = vand.u32 4294901760, %v107_v45  ;;  %v655_v8 = vsel %vm105_vm5, 1.0, %v649_v10  ;;  %v197_v53 = vsub.f32 %v106_v9, %v1402_v11 }
  0x67   :  { %v656_v15 = vand.u32 4294901760, %v655_v8  ;;  %v745_v3 = vsub.f32 %v654_v12, %v1409_v14 }
  0x68   :  { %109 = vmatprep.subr.mxu0 %v108_v52  ;;  %v191_v16 = vsub.f32 %v107_v45, %v108_v52  ;;  %v198_v17 = vand.u32 4294901760, %v197_v53 }
  0x69   :  { %657 = vmatprep.subr.mxu1 %v656_v15  ;;  %111 = vmatpush1.xpose.msra.mxu0 %v1402_v11  ;;  %v739_v19 = vsub.f32 %v655_v8, %v656_v15  ;;  %v746_v20 = vand.u32 4294901760, %v745_v3 }
  0x6a   :  { %659 = vmatpush1.xpose.msra.mxu1 %v1409_v14  ;;  %v192_v21 = vand.u32 4294901760, %v191_v16  ;;  %v199_v24 = vsub.f32 %v197_v53, %v198_v17 }
  0x6b   :  { %v740_v25 = vand.u32 4294901760, %v739_v19  ;;  %v747_v26 = vsub.f32 %v745_v3, %v746_v20 }
  0x6c   :  { %185 = vmatmul.mubr.f32.vlgmr.msra.gmra.mrb[0].mxu0 %v184_v4  ;;  %v193_v27 = vsub.f32 %v191_v16, %v192_v21  ;;  %v200_v30 = vand.u32 4294901760, %v199_v24 }
  0x6d   :  { %733 = vmatmul.mubr.f32.vlgmr.msra.gmra.mrb[0].mxu1 %v732_v18  ;;  %v741_v29 = vsub.f32 %v739_v19, %v740_v25  ;;  %1150 = vmatprep.mubr.msk.f32.mxu0 %vm1318_vm1, %v1261_v31  ;;  %v748_v33 = vand.u32 4294901760, %v747_v26 }
  0x6e   :  { %v194_v32 = vand.u32 4294901760, %v193_v27  ;;  %1158 = vmatprep.mubr.msk.f32.mxu1 %vm1322_vm2, %v1261_v31 }
  0x6f   :  { %v742_v34 = vand.u32 4294901760, %v741_v29 }
  0x70   :  { %195 = vmatprep.subr.mxu0 %v194_v32 }
  0x71   :  { %743 = vmatprep.subr.mxu1 %v742_v34  ;;  %201 = vmatpush1.xpose.msra.mxu0 %v200_v30 }
  0x72   :  { %749 = vmatpush1.xpose.msra.mxu1 %v748_v33  ;;  %274 = vmatprep.subr.mxu0 %v191_v16 }
  0x73   :  { %822 = vmatprep.subr.mxu1 %v739_v19 }
  0x74   :  { %1151 = vmatmul.mubr.msk.f32.vlgmr.msra.gmra.mrb[0].mxu0 %vm1348_vm3, %v1261_v31 }
  0x75   :  { %1159 = vmatmul.mubr.msk.f32.vlgmr.msra.gmra.mrb[0].mxu1 %vm1361_vm4, %v1261_v31  ;;  %277 = vmatpush1.xpose.msra.mxu0 %v197_v53 }
  0x76   :  { %825 = vmatpush1.xpose.msra.mxu1 %v745_v3  ;;  %342 = vmatprep.mubr.f32.mxu0 %v1332_v36 }
  0x77   :  { %890 = vmatprep.mubr.f32.mxu1 %v1334_v37  ;;  %351 = vmatprep.subr.mxu0 %v108_v52 }
  0x78   :  { %899 = vmatprep.subr.mxu1 %v656_v15 }
  0x7c   :  { %345 = vmatmul.mubr.f32.vlgmr.msra.gmra.mrb[0].mxu0 %v1391_v55 }
  0x7d   :  { %893 = vmatmul.mubr.f32.vlgmr.msra.gmra.mrb[0].mxu1 %v1393_v56  ;;  %353 = vmatpush1.xpose.msra.mxu0 %v1402_v11 }
  0x7e   :  { %901 = vmatpush1.xpose.msra.mxu1 %v1409_v14  ;;  %419 = vmatprep.mubr.f32.mxu0 %v176_v42 }
  0x7f   :  { %967 = vmatprep.mubr.f32.mxu1 %v724_v44  ;;  %431 = vmatprep.subr.mxu0 %v192_v21 }
  0x80   :  { %979 = vmatprep.subr.mxu1 %v740_v25 }
  0x84   :  { %423 = vmatmul.mubr.f32.vlgmr.msra.gmra.mrb[0].mxu0 %v182_v63 }
  0x85   :  { %971 = vmatmul.mubr.f32.vlgmr.msra.gmra.mrb[0].mxu1 %v730_v5  ;;  %435 = vmatpush1.xpose.msra.mxu0 %v198_v17 }
  0x86   :  { %983 = vmatpush1.xpose.msra.mxu1 %v746_v20  ;;  %1152 = vmatprep.mubr.msk.f32.mxu0 %vm1318_vm1, %v1261_v31 }
  0x87   :  { %1160 = vmatprep.mubr.msk.f32.mxu1 %vm1322_vm2, %v1261_v31  ;;  %507 = vmatprep.subr.mxu0 %v108_v52 }
  0x88   :  { %1055 = vmatprep.subr.mxu1 %v656_v15 }
  0x8c   :  { %1153 = vmatmul.mubr.msk.f32.vlgmr.msra.gmra.mrb[0].mxu0 %vm1348_vm3, %v1261_v31 }
  0x8d   :  { %1161 = vmatmul.mubr.msk.f32.vlgmr.msra.gmra.mrb[0].mxu1 %vm1361_vm4, %v1261_v31  ;;  %509 = vmatpush1.xpose.msra.mxu0 %v1402_v11 }
  0x8e   :  { %1057 = vmatpush1.xpose.msra.mxu1 %v1409_v14  ;;  %1154 = vmatprep.mubr.msk.f32.mxu0 %vm1318_vm1, %v1261_v31 }
  0x8f   :  { %1162 = vmatprep.mubr.msk.f32.mxu1 %vm1322_vm2, %v1261_v31 }
  0x94   :  { %1155 = vmatmul.mubr.msk.f32.vlgmr.msra.gmra.mrb[0].mxu0 %vm1348_vm3, %v1261_v31 }
  0x95   :  { %1163 = vmatmul.mubr.msk.f32.vlgmr.msra.gmra.mrb[0].mxu1 %vm1361_vm4, %v1261_v31 }
  0xc6   :  { %v586_v36 = vpop.xlane.xlu0 %585 }
  0xca   :  { %v1134_v40 = vpop.xlane.xlu0 %1133 }
 0x167   :  { %v576_v37 = vpop.f32.mrb[0].mxu0 }
 0x168   :  { %v1124_v42 = vpop.f32.mrb[0].mxu1  ;;  %v588_v44 = vsub.f32 %v576_v37, %v586_v36  ;;  %v578_v35 = vpop.f32.mrb[1].mxu0 }
 0x169   :  { %v1135_v38 = vadd.f32 %v1124_v42, %v576_v37  ;;  %v1126_v39 = vpop.f32.mrb[1].mxu1 }
 0x16a   :  { %v1136_v41 = vadd.f32 %v1124_v42, %v588_v44 }
 0x16c   :  { %v1137_v22 = vsub.f32 %v1136_v41, %v1134_v40 }
 0x16e   :  { %v1139_v23 = vsel %vm1138_vm6, %v1135_v38, %v1137_v22 }
 0x16f   :  { %1141 = vst.msk [vmem:[%s1464_s2] sm:$0xf] %vm1140_vm7, %v1139_v23 }
 0x170   :  { %1146 = vsyncpa [#allocation3], 1 }
 0x171   :  { %1147 = vsyncpa [#allocation5], 1 }

</bundles_post_ra>
